<compile_context>
chip_gen: v5e
topology: v5e:2x2
jax: 0.10.0
libtpu: 0.0.40
codegen_flags: <defaults>
</compile_context>

<pallas_src>
import functools

import jax
import jax.numpy as jnp
from jax.experimental import pallas as pl
from jax.experimental.pallas import tpu as pltpu

SMOOTH = 1e-6  # matches the PyTorch module (cancels exactly in union - inter)


def _uml_kernel(x_ref, t_ref, out_ref, acc_ref, *, scale):
    """One pixel tile: x_ref (N, C, T) logits, t_ref (N, T) int32 targets.

    Accumulates sum_{n,c,pixel} (p + onehot - 2*p*onehot) into a full-tile VMEM
    accumulator; the last pixel tile of each core reduces once and writes the
    already-scaled per-core partial into its (1, 8, 128) output block.
    """
    i = pl.program_id(1)

    @pl.when(i == 0)
    def _():
        acc_ref[...] = jnp.zeros_like(acc_ref)

    x = x_ref[...].astype(jnp.float32)          # (N, C, T) classes on sublanes
    t = t_ref[...]                              # (N, T) int32

    # Numerically stable softmax over the class (sublane) axis.
    m = jnp.max(x, axis=1, keepdims=True)       # (N, 1, T)
    e = jnp.exp(x - m)
    s = jnp.sum(e, axis=1, keepdims=True)       # (N, 1, T)
    p = e * pl.reciprocal(s, approx=True)       # (N, C, T)  (divide -> EUP)

    cls = jax.lax.broadcasted_iota(jnp.int32, x.shape, 1)
    onehot = cls == t[:, None, :]               # (N, C, T) bool

    # union - inter  ==  p + onehot - 2*p*onehot  ==  where(onehot, 1 - p, p)
    acc_ref[...] += jnp.where(onehot, 1.0 - p, p)

    @pl.when(i == pl.num_programs(1) - 1)
    def _():
        partial = jnp.sum(acc_ref[...]) * scale
        out_ref[...] = jnp.full(out_ref.shape, partial, dtype=out_ref.dtype)


def union_minus_intersection_loss(inputs_nchw, target_nhw, *,
                                  n_classes=12, target_shape=(12, 512, 512),
                                  tile_pixels=4096):
    """JAX wrapper: NCHW logits + NHW int targets -> scalar loss."""
    N, C, H, W = inputs_nchw.shape
    assert C == n_classes
    P = H * W
    assert target_nhw.shape == (N, H, W)

    ui_weight = 1.0 / (target_shape[1] * target_shape[2] / n_classes)

    # pixels-on-lanes layout: (N, C, H, W) -> (N, C, P) is a free reshape
    # (no transpose); keep the logits in their native dtype.
    x = inputs_nchw.reshape(N, C, P)
    t = target_nhw.reshape(N, P).astype(jnp.int32)

    # Pixel tile: multiple of 128 that divides P (or the full P).
    if P % 128 == 0 and tile_pixels < P:
        tp = max(128, (min(tile_pixels, P) // 128) * 128)
        while P % tp:
            tp -= 128
    else:
        tp = P
    num_tiles = P // tp

    # Split pixel tiles across two TensorCores on v7x (serial, harmless on
    # single-core v5e/v6e).
    ncores = 2 if num_tiles % 2 == 0 else 1
    tiles_per_core = num_tiles // ncores

    kernel = functools.partial(
        _uml_kernel, scale=float(ui_weight) / float(N * C))

    out = pl.pallas_call(
        kernel,
        out_shape=jax.ShapeDtypeStruct((ncores, 8, 128), jnp.float32),
        grid_spec=pltpu.PrefetchScalarGridSpec(
            num_scalar_prefetch=0,
            grid=(ncores, tiles_per_core),
            in_specs=[
                pl.BlockSpec((N, C, tp),
                             lambda c, i: (0, 0, c * tiles_per_core + i)),
                pl.BlockSpec((N, tp),
                             lambda c, i: (0, c * tiles_per_core + i)),
            ],
            out_specs=pl.BlockSpec((1, 8, 128), lambda c, i: (c, 0, 0)),
            scratch_shapes=[pltpu.VMEM((N, C, tp), jnp.float32)],
        ),
        compiler_params=pltpu.CompilerParams(
            dimension_semantics=("parallel", "arbitrary"),
            vmem_limit_bytes=32 * 1024 * 1024,
        ),
    )(x, t)

    # One scaled partial per core; sum them (exact, linear).
    return jnp.sum(out[:, 0, 0])


def _reference_loss(inputs_nchw, target_nhw, *,
                    n_classes=12, target_shape=(12, 512, 512)):
    """Pure-JAX reference replicating the PyTorch module exactly."""
    ui_weight = 1.0 / (target_shape[1] * target_shape[2] / n_classes)
    N = inputs_nchw.shape[0]
    p = jax.nn.softmax(inputs_nchw.astype(jnp.float32), axis=1)
    oh = jax.nn.one_hot(target_nhw, n_classes, axis=1, dtype=jnp.float32)
    inter = (p * oh).reshape(N, n_classes, -1).sum(axis=2) + SMOOTH
    union = (p + oh - p * oh).reshape(N, n_classes, -1).sum(axis=2) + SMOOTH
    return jnp.mean(union - inter) * ui_weight


if __name__ == "__main__":
    # Small shapes consistent with the module: N=2, 12 classes, 32x32 spatial.
    N, C, H, W = 2, 12, 32, 32
    key = jax.random.PRNGKey(0)
    k_x, k_t = jax.random.split(key)
    inputs = jax.random.normal(k_x, (N, C, H, W), dtype=jnp.float32)
    target = jax.random.randint(k_t, (N, H, W), 0, C, dtype=jnp.int32)

    # tile_pixels=128 here so the demo exercises both the multi-tile
    # accumulation path and the 2-way "parallel" core split (8 tiles -> 2 x 4).
    loss = union_minus_intersection_loss(inputs, target, tile_pixels=128)
    loss = jax.block_until_ready(loss)

    ref = jax.block_until_ready(_reference_loss(inputs, target))
    assert abs(float(loss) - float(ref)) < 1e-4, (float(loss), float(ref))

    print("KERNEL_OK")
</pallas_src>

<mosaic_0001>
module attributes {stable_mosaic.version = 11 : i64} {
  func.func @_uml_kernel(%arg0: i32, %arg1: i32, %arg2: memref<2x12x128xf32, #tpu.memory_space<vmem>>, %arg3: memref<2x128xi32, #tpu.memory_space<vmem>>, %arg4: memref<1x8x128xf32, #tpu.memory_space<vmem>>, %arg5: memref<2x12x128xf32, #tpu.memory_space<vmem>>) attributes {dimension_semantics = [#tpu.dimension_semantics<parallel>, #tpu.dimension_semantics<arbitrary>], iteration_bounds = array<i64: 2, 4>, scalar_prefetch = 0 : i64, scratch_operands = 1 : i64, tpu.core_type = #tpu.core_type<tc>, window_params = [{transform_indices = @transform_0, window_bounds = array<i64: 2, 12, 128>}, {transform_indices = @transform_1, window_bounds = array<i64: 2, 128>}, {transform_indices = @transform_2, window_bounds = array<i64: 1, 8, 128>}]} {
    %c0_i32 = arith.constant 0 : i32
    %0 = arith.cmpi eq, %arg1, %c0_i32 : i32
    %1 = arith.extui %0 : i1 to i32
    %c0_i32_0 = arith.constant 0 : i32
    %2 = arith.cmpi ne, %1, %c0_i32_0 : i32
    scf.if %2 {
      %cst_14 = arith.constant 0.000000e+00 : f32
      %28 = vector.broadcast %cst_14 : f32 to vector<2x12x128xf32>
      %c0_15 = arith.constant 0 : index
      %c0_16 = arith.constant 0 : index
      %c0_17 = arith.constant 0 : index
      %29 = vector.load %arg5[%c0_15, %c0_16, %c0_17] : memref<2x12x128xf32, #tpu.memory_space<vmem>>, vector<2x12x128xf32>
      tpu.vector_store %arg5[%c0_15, %c0_16, %c0_17], %28 {strides = array<i32>} : memref<2x12x128xf32, #tpu.memory_space<vmem>>, vector<2x12x128xf32>,
    } else {
    }
    %c0 = arith.constant 0 : index
    %c0_1 = arith.constant 0 : index
    %c0_2 = arith.constant 0 : index
    %3 = vector.load %arg2[%c0, %c0_1, %c0_2] : memref<2x12x128xf32, #tpu.memory_space<vmem>>, vector<2x12x128xf32>
    %c0_3 = arith.constant 0 : index
    %c0_4 = arith.constant 0 : index
    %4 = vector.load %arg3[%c0_3, %c0_4] : memref<2x128xi32, #tpu.memory_space<vmem>>, vector<2x128xi32>
    %cst = arith.constant dense<0xFF800000> : vector<2x128xf32>
    %5 = vector.multi_reduction <maximumf>, %3, %cst [1] : vector<2x12x128xf32> to vector<2x128xf32>
    %6 = vector.shape_cast %5 : vector<2x128xf32> to vector<2x1x128xf32>
    %7 = vector.broadcast %6 : vector<2x1x128xf32> to vector<2x12x128xf32>
    %8 = arith.subf %3, %7 : vector<2x12x128xf32>
    %9 = math.exp %8 : vector<2x12x128xf32>
    %cst_5 = arith.constant dense<0.000000e+00> : vector<2x128xf32>
    %10 = vector.multi_reduction <add>, %9, %cst_5 [1] : vector<2x12x128xf32> to vector<2x128xf32>
    %11 = vector.shape_cast %10 : vector<2x128xf32> to vector<2x1x128xf32>
    %12 = tpu.reciprocal %11 {approx = true} : vector<2x1x128xf32> -> vector<2x1x128xf32>
    %13 = vector.broadcast %12 : vector<2x1x128xf32> to vector<2x12x128xf32>
    %14 = arith.mulf %9, %13 : vector<2x12x128xf32>
    %15 = tpu.iota {dimensions = array<i32: 1>} : vector<2x12x128xi32>
    %16 = vector.shape_cast %4 : vector<2x128xi32> to vector<2x1x128xi32>
    %17 = vector.broadcast %16 : vector<2x1x128xi32> to vector<2x12x128xi32>
    %18 = arith.cmpi eq, %15, %17 : vector<2x12x128xi32>
    %c0_6 = arith.constant 0 : index
    %c0_7 = arith.constant 0 : index
    %c0_8 = arith.constant 0 : index
    %19 = vector.load %arg5[%c0_6, %c0_7, %c0_8] : memref<2x12x128xf32, #tpu.memory_space<vmem>>, vector<2x12x128xf32>
    %cst_9 = arith.constant 1.000000e+00 : f32
    %20 = vector.broadcast %cst_9 : f32 to vector<2x12x128xf32>
    %21 = arith.subf %20, %14 : vector<2x12x128xf32>
    %22 = arith.select %18, %21, %14 : vector<2x12x128xi1>, vector<2x12x128xf32>
    %23 = arith.addf %19, %22 : vector<2x12x128xf32>
    %c0_10 = arith.constant 0 : index
    %c0_11 = arith.constant 0 : index
    %c0_12 = arith.constant 0 : index
    %24 = vector.load %arg5[%c0_10, %c0_11, %c0_12] : memref<2x12x128xf32, #tpu.memory_space<vmem>>, vector<2x12x128xf32>
    tpu.vector_store %arg5[%c0_10, %c0_11, %c0_12], %23 {strides = array<i32>} : memref<2x12x128xf32, #tpu.memory_space<vmem>>, vector<2x12x128xf32>,
    %c3_i32 = arith.constant 3 : i32
    %25 = arith.cmpi eq, %arg1, %c3_i32 : i32
    %26 = arith.extui %25 : i1 to i32
    %c0_i32_13 = arith.constant 0 : i32
    %27 = arith.cmpi ne, %26, %c0_i32_13 : i32
    scf.if %27 {
      %c0_14 = arith.constant 0 : index
      %c0_15 = arith.constant 0 : index
      %c0_16 = arith.constant 0 : index
      %28 = vector.load %arg5[%c0_14, %c0_15, %c0_16] : memref<2x12x128xf32, #tpu.memory_space<vmem>>, vector<2x12x128xf32>
      %29 = vector.shape_cast %28 : vector<2x12x128xf32> to vector<1x2x12x128xf32>
      %cst_17 = arith.constant dense<0.000000e+00> : vector<1xf32>
      %30 = vector.multi_reduction <add>, %29, %cst_17 [1, 2, 3] : vector<1x2x12x128xf32> to vector<1xf32>
      %31 = vector.shape_cast %30 : vector<1xf32> to vector<1x1x1x1xf32>
      %32 = vector.extract %31[0, 0, 0, 0] : f32 from vector<1x1x1x1xf32>
      %cst_18 = arith.constant 1.90734863E-6 : f32
      %33 = arith.mulf %32, %cst_18 : f32
      %34 = vector.broadcast %33 : f32 to vector<1x8x128xf32>
      %c0_19 = arith.constant 0 : index
      %c0_20 = arith.constant 0 : index
      %c0_21 = arith.constant 0 : index
      %35 = vector.load %arg4[%c0_19, %c0_20, %c0_21] : memref<1x8x128xf32, #tpu.memory_space<vmem>>, vector<1x8x128xf32>
      tpu.vector_store %arg4[%c0_19, %c0_20, %c0_21], %34 {strides = array<i32>} : memref<1x8x128xf32, #tpu.memory_space<vmem>>, vector<1x8x128xf32>,
    } else {
    }
    return
  }
  func.func @transform_0(%arg0: i32, %arg1: i32) -> (i32, i32, i32) {
    %c4_i32 = arith.constant 4 : i32
    %0 = arith.muli %arg0, %c4_i32 : i32
    %1 = arith.addi %0, %arg1 : i32
    %c0_i32 = arith.constant 0 : i32
    %c0_i32_0 = arith.constant 0 : i32
    %c0_i32_1 = arith.constant 0 : i32
    return %c0_i32, %c0_i32_0, %1 : i32, i32, i32
  }
  func.func @transform_1(%arg0: i32, %arg1: i32) -> (i32, i32) {
    %c4_i32 = arith.constant 4 : i32
    %0 = arith.muli %arg0, %c4_i32 : i32
    %1 = arith.addi %0, %arg1 : i32
    %c0_i32 = arith.constant 0 : i32
    %c0_i32_0 = arith.constant 0 : i32
    return %c0_i32, %1 : i32, i32
  }
  func.func @transform_2(%arg0: i32, %arg1: i32) -> (i32, i32, i32) {
    %c0_i32 = arith.constant 0 : i32
    %c0_i32_0 = arith.constant 0 : i32
    %c0_i32_1 = arith.constant 0 : i32
    return %arg0, %c0_i32, %c0_i32_0 : i32, i32, i32
  }
}

</mosaic_0001>

<bundles_post_ra>
// kernel: tpu_custom_call.1
= control target key start
LH: loop header
LB: loop body
LE: loop exit
PB: predicated region body
PF: predicated region fallthrough
CT: control target
= control target key end

     0   :  { %7 = vsyncpa [#allocation5], 0  ;;  %s899_s0 = inlined_call_operand.vmem [shape: f32[2,12,1024], index: 0, kind: input, shape index: {}]   ;;  %s900_s1 = inlined_call_operand.vmem [shape: s32[2,1024], index: 1, kind: input, shape index: {}]   ;;  %s901_s2 = inlined_call_operand.hbm [shape: f32[2,8,128], index: 2, kind: output, shape index: {}]  }
   0x1   :  { %9 = vsyncpa [#allocation5 + $0x1], 0  ;;  %s717_s9 = smov 0   ;;  %s719_s10 = smov 0  }
   0x2   :  { %s721_s11 = smov 0   ;;  %s723_s12 = smov 0  }
   0x3   :  { %s725_s13 = smov 0   ;;  %s727_s14 = smov 0  }
   0x4   :  { %s729_s15 = smov 0   ;;  %s731_s16 = smov 0  }
   0x5   :  { %s733_s17 = smov 0   ;;  %s735_s18 = smov 0  }
   0x6 LB: > { %s465_s19 = sadd.s32 4294967295, %s699_s18   ;;  %s466_s20 = sadd.s32 4294967294, %s699_s18   ;;  %s699_s18 = sphi %s735_s18, %s15_s18   ;;  %s695_s17 = sphi %s733_s17, %s913_s17   ;;  %s691_s16 = sphi %s731_s16, %s912_s16   ;;  %s687_s15 = sphi %s729_s15, %s911_s15   ;;  %s683_s14 = sphi %s727_s14, %s910_s14   ;;  %s679_s13 = sphi %s725_s13, %s909_s13   ;;  %s675_s12 = sphi %s723_s12, %s908_s12   ;;  %s671_s11 = sphi %s721_s11, %s907_s11   ;;  %s667_s10 = sphi %s719_s10, %s906_s10   ;;  %s663_s9 = sphi %s717_s9, %s905_s9  }
   0x7   : > { %s24_s21 = sadd.s32 1, %s691_s16  ;;  %s27_s22 = sadd.s32 1, %s695_s17 }
   0x8   : > { %p25_p0 = scmp.ge.s32.totalorder %s24_s21, 4  ;;  %s467_s23 = sshll.u32 %s695_s17, 2 }
   0x9   : > { %s773_s24 = sadd.s32 %s691_s16, %s467_s23  ;;  %s38_s25 = sadd.s32 1, %s679_s13 }
   0xa   : > { %s915_s21 = smov (%p25_p0, %s24_s21), 0  ;;  %s917_s22 = smov (!%p25_p0, %s27_s22), %s695_s17 }
   0xb   : > { %p45_p1 = scmp.ne.s32.totalorder %s679_s13, %s675_s12  ;;  %p46_p2 = scmp.eq.s32.totalorder %s699_s18, 0 }
   0xc   : > { %p29_p3 = scmp.ge.s32.totalorder %s917_s22, 2  ;;  %s94_s26 = sadd.s32 1, %s671_s11 }
   0xd   : > { %p783_p4 = por %p46_p2, %p45_p1  ;;  %p104_p5 = scmp.ne.s32.totalorder %s671_s11, %s667_s10 }
   0xe   : > { %s919_s22 = smov (%p29_p3, %s917_s22), 0  ;;  %p105_p6 = scmp.eq.s32.totalorder %s465_s19, 7 }
   0xf   : > { %p110_p7 = scmp.ne.s32.totalorder %s667_s10, %s663_s9  ;;  %s468_s28 = sshll.u32 %s919_s22, 2 }
  0x10   : > { %s91_s29 = ssub.s32 %s695_s17, %s919_s22  ;;  %s34_s30 = sadd.s32 %s468_s28, %s915_s21 }
  0x11   : > { %p92_p8 = scmp.eq.s32.totalorder %s91_s29, 0  ;;  %s35_s3 = ssub.s32 %s773_s24, %s34_s30 }
  0x12   : > { %p798_p9 = por %p105_p6, %p104_p5  ;;  %p36_p10 = scmp.eq.s32.totalorder %s35_s3, 0 }
  0x13   : > { %p111_p11 = scmp.eq.s32.totalorder %s466_s20, 7  ;;  %p472_p13 = scmp.ge.s32.totalorder %s699_s18, 8 }
  0x14   : > { %s803_s5 = scalar_select %p92_p8, %s671_s11, %s94_s26  }
  0x15   : > { %s806_s6 = scalar_select %p36_p10, %s679_s13, %s38_s25  }
  0x16   : > { %p808_p12 = por %p111_p11, %p110_p7  ;;  %127 = sbr.rel (%p472_p13) target bundleno = 35 (0x23), region = 16 }
  0x1b   : > { %130 = sbr.rel (!%p783_p4) target bundleno = 35 (0x23), region = 20  ;;  %s132_s8 = sand.u32 (%p783_p4), 1, %s679_s13  }
  0x1c   : > { %s475_s19 = sshll.u32 (%p783_p4), %s773_s24, 3  ;;  %s473_s23 = sshll.u32 (%p783_p4), %s132_s8, 5 }
  0x1d   : > { %s138_s25 = scalar_lea.vmem (%p783_p4), %s899_s0, %s475_s19  ;;  %s134_s28 = scalar_lea.vmem (%p783_p4), [#allocation3], %s473_s23 }
  0x1e   : > { %v173_v0 = vld [vmem:[%s138_s25] sm:$0xff] (%p783_p4) }
  0x1f   : > { %v175_v1 = vld [vmem:[%s138_s25 + $0x40] sm:$0xff] (%p783_p4)  ;;  %174 = vst [vmem:[%s134_s28] sm:$0xff] (%p783_p4), %v173_v0 }
  0x20   : > { %v177_v2 = vld [vmem:[%s138_s25 + $0x80] sm:$0xff]  ;;  %176 = vst [vmem:[%s134_s28 + $0x8] sm:$0xff] %v175_v1 }
  0x21   : > { %v179_v3 = vld [vmem:[%s138_s25 + $0xc0] sm:$0xff]  ;;  %178 = vst [vmem:[%s134_s28 + $0x10] sm:$0xff] %v177_v2 }
  0x22   : > { %180 = vst [vmem:[%s134_s28 + $0x18] sm:$0xff] %v179_v3 }
  0x23 PF: > { %p476_p0 = scmp.ge.s32.totalorder %s699_s18, 1  ;;  %p196_p1 = scmp.lt.s32.totalorder %s699_s18, 9 }
  0x25   : > { %p197_p2 = pnand %p476_p0, %p196_p1 }
  0x26   : > { %s203_s24 = sand.u32 (!%p197_p2), 1, %s675_s12   ;;  %s227_s27 = sand.u32 (!%p197_p2), 1, %s667_s10  }
  0x27   : > { %200 = sbr.rel (%p197_p2) target bundleno = 325 (0x145), region = 62  ;;  %s477_s29 = sshll.u32 (!%p197_p2), %s203_s24, 5 }
  0x28   : > { %s826_s30 = sshll.u32 (!%p197_p2), %s227_s27, 3  ;;  %s479_s3 = sshll.u32 (!%p197_p2), %s687_s15, 2 }
  0x29   : > { %s233_s8 = sadd.s32 (!%p197_p2), %s683_s14, %s479_s3  ;;  %s205_s25 = scalar_lea.vmem (!%p197_p2), [#allocation3], %s477_s29 }
  0x2a   : > { %p234_p3 = scmp.lt.s32.totalorder (!%p197_p2), %s233_s8, 7  ;;  %s229_s28 = scalar_lea.vmem (!%p197_p2), [#allocation4], %s826_s30 }
  0x2b   : > { %p481_p4 = scmp.ne.s32.totalorder (!%p197_p2), %s683_s14, 0 }
  0x2c   : > { %s921_s8 = smov (!%p234_p3, %s233_s8), 7 }
  0x2d   : > { %s480_s19 = sshll.u32 %s921_s8, 1  ;;  %243 = sbr.rel (%p481_p4) target bundleno = 55 (0x37), region = 70 }
  0x2e   : > { %s833_s26 = scalar_lea.vmem %s900_s1, %s480_s19 }
  0x32   : > { %v701_v4 = vmov 0.0  }
  0x33   : > { %244 = vst [vmem:[#allocation2 + $0x10] sm:$0xff] %v701_v4 }
  0x34   : > { %245 = vst [vmem:[#allocation2] sm:$0xf] %v701_v4 }
  0x35   : > { %246 = vst [vmem:[#allocation2 + $0x18] sm:$0xff] %v701_v4 }
  0x36   : > { %247 = vst [vmem:[#allocation2 + $0x8] sm:$0xf] %v701_v4 }
  0x37 PF: > { %v248_v5 = vld [vmem:[%s205_s25] sm:$0xff]  ;;  %v249_v6 = vld [vmem:[%s205_s25 + $0x8] sm:$0xf]  ;;  %vm253_vm0 = vcmask 1043456   ;;  %v250_v8 = vld [vmem:[%s205_s25 + $0x10] sm:$0xff]  ;;  %v304_v49 = vlaneseq  ;;  %p482_p5 = scmp.ne.s32.totalorder %s683_s14, 3 }
  0x38   : > { %v254_v7 = vsel %vm253_vm0, %v249_v6, -inf  ;;  %v251_v9 = vld [vmem:[%s205_s25 + $0x18] sm:$0xf]  ;;  %v252_v53 = vld [vmem:[%s833_s26] sm:$0x3] }
  0x39   : > { %v255_v10 = vmax.f32 %v248_v5, %v254_v7  ;;  %v262_v11 = vsel %vm253_vm0, %v251_v9, -inf  ;;  %v305_v54 = vshrl.u32 %v304_v49, 7  ;;  %v307_v56 = vrot.slane %v252_v53, 1 }
  0x3a   : > { %v263_v12 = vmax.f32 %v250_v8, %v262_v11  ;;  %v308_v57 = vperm.slane %v252_v53, 0  ;;  %v314_v0 = vld [vmem:[#allocation2 + $0x10] sm:$0xff] }
  0x3b   : > { %v256_v13 = vrot.slane %v255_v10, 4  ;;  %v306_v58 = vadd.s32 8, %v305_v54  ;;  %v309_v60 = vperm.slane %v307_v56, 0  ;;  %v315_v2 = vld [vmem:[#allocation2] sm:$0xf] }
  0x3c   : > { %v264_v14 = vrot.slane %v263_v12, 4  ;;  %vm310_vm1 = vcmp.eq.s32.totalorder %v305_v54, %v308_v57 }
  0x3d   : > { %v257_v15 = vmax.f32 %v255_v10, %v256_v13  ;;  %vm311_vm2 = vcmp.eq.s32.totalorder %v306_v58, %v308_v57  ;;  %vm312_vm3 = vcmp.eq.s32.totalorder %v305_v54, %v309_v60  ;;  %vm313_vm4 = vcmp.eq.s32.totalorder %v306_v58, %v309_v60  ;;  %v317_v10 = vld [vmem:[#allocation2 + $0x8] sm:$0xf] }
  0x3e   : > { %v265_v16 = vmax.f32 %v263_v12, %v264_v14 }
  0x3f   : > { %v258_v17 = vrot.slane %v257_v15, 2 }
  0x40   : > { %v266_v18 = vrot.slane %v265_v16, 2 }
  0x41   : > { %v259_v19 = vmax.f32 %v257_v15, %v258_v17 }
  0x42   : > { %v267_v20 = vmax.f32 %v265_v16, %v266_v18 }
  0x43   : > { %v260_v21 = vrot.slane %v259_v19, 1 }
  0x44   : > { %v268_v22 = vrot.slane %v267_v20, 1 }
  0x45   : > { %v261_v23 = vmax.f32 %v259_v19, %v260_v21 }
  0x46   : > { %v269_v24 = vmax.f32 %v267_v20, %v268_v22 }
  0x47   : > { %v270_v25 = vsub.f32 %v248_v5, %v261_v23  ;;  %v271_v26 = vsub.f32 %v249_v6, %v261_v23 }
  0x48   : > { %v272_v27 = vsub.f32 %v250_v8, %v269_v24  ;;  %v273_v28 = vsub.f32 %v251_v9, %v269_v24  ;;  %v316_v8 = vld [vmem:[#allocation2 + $0x18] sm:$0xff] }
  0x49   : > { %v274_v29 = vmul.f32 1.442695, %v270_v25  ;;  %v276_v30 = vmul.f32 1.442695, %v271_v26 }
  0x4a   : > { %v278_v31 = vmul.f32 1.442695, %v272_v27  ;;  %v280_v32 = vmul.f32 1.442695, %v273_v28 }
  0x4b   : > { %577 = vpow2.f32 %v274_v29 }
  0x4c   : > { %579 = vpow2.f32 %v276_v30 }
  0x4d   : > { %581 = vpow2.f32 %v278_v31 }
  0x4e   : > { %583 = vpow2.f32 %v280_v32 }
  0x51   : > { %v578_v33 = vpop.eup %577 }
  0x52   : > { %v580_v34 = vpop.eup %579 }
  0x53   : > { %v582_v35 = vpop.eup %581  ;;  %v282_v36 = vsel %vm253_vm0, %v580_v34, 0.0 }
  0x54   : > { %v584_v37 = vpop.eup %583  ;;  %v283_v38 = vadd.f32 %v578_v33, %v282_v36 }
  0x55   : > { %v290_v39 = vsel %vm253_vm0, %v584_v37, 0.0 }
  0x56   : > { %v284_v40 = vrot.slane %v283_v38, 4  ;;  %v291_v41 = vadd.f32 %v582_v35, %v290_v39 }
  0x58   : > { %v285_v42 = vadd.f32 %v284_v40, %v283_v38  ;;  %v292_v43 = vrot.slane %v291_v41, 4 }
  0x5a   : > { %v286_v44 = vrot.slane %v285_v42, 2  ;;  %v293_v45 = vadd.f32 %v292_v43, %v291_v41 }
  0x5c   : > { %v287_v46 = vadd.f32 %v286_v44, %v285_v42  ;;  %v294_v47 = vrot.slane %v293_v45, 2 }
  0x5e   : > { %v288_v48 = vrot.slane %v287_v46, 1  ;;  %v295_v50 = vadd.f32 %v294_v47, %v293_v45 }
  0x60   : > { %v289_v51 = vadd.f32 %v288_v48, %v287_v46  ;;  %v296_v52 = vrot.slane %v295_v50, 1 }
  0x62   : > { %585 = vrcp.f32 %v289_v51  ;;  %v297_v55 = vadd.f32 %v296_v52, %v295_v50 }
  0x64   : > { %587 = vrcp.f32 %v297_v55 }
  0x68   : > { %v586_v59 = vpop.eup %585 }
  0x69   : > { %v300_v61 = vmul.f32 %v586_v59, %v578_v33  ;;  %v301_v62 = vmul.f32 %v586_v59, %v580_v34 }
  0x6a   : > { %v588_v63 = vpop.eup %587 }
  0x6b   : > { %v318_v1 = vsub.f32 1.0, %v300_v61  ;;  %v319_v3 = vsub.f32 1.0, %v301_v62  ;;  %v302_v4 = vmul.f32 %v588_v63, %v582_v35  ;;  %v303_v5 = vmul.f32 %v588_v63, %v584_v37 }
  0x6d   : > { %v322_v6 = vsel %vm310_vm1, %v318_v1, %v300_v61  ;;  %v323_v7 = vsel %vm311_vm2, %v319_v3, %v301_v62  ;;  %v320_v9 = vsub.f32 1.0, %v302_v4  ;;  %v321_v11 = vsub.f32 1.0, %v303_v5 }
  0x6e   : > { %v326_v12 = vadd.f32 %v322_v6, %v314_v0  ;;  %v327_v13 = vadd.f32 %v323_v7, %v315_v2 }
  0x6f   : > { %v324_v14 = vsel %vm312_vm3, %v320_v9, %v302_v4  ;;  %v325_v15 = vsel %vm313_vm4, %v321_v11, %v303_v5  ;;  %337 = sbr.rel (%p482_p5) target bundleno = 310 (0x136), region = 74 }
  0x70   : > { %330 = vst [vmem:[#allocation2 + $0x10] sm:$0xff] %v326_v12  ;;  %v328_v16 = vadd.f32 %v324_v14, %v316_v8  ;;  %v329_v17 = vadd.f32 %v325_v15, %v317_v10 }
  0x71   : > { %331 = vst [vmem:[#allocation2] sm:$0xf] %v327_v13 }
  0x72   : > { %332 = vst [vmem:[#allocation2 + $0x18] sm:$0xff] %v328_v16 }
  0x73   : > { %333 = vst [vmem:[#allocation2 + $0x8] sm:$0xf] %v329_v17 }
  0x77   : > { %v338_v18 = vld [vmem:[#allocation2 + $0x10] sm:$0xff] }
  0x78   : > { %v339_v19 = vld [vmem:[#allocation2] sm:$0xf] }
  0x79   : > { %v340_v20 = vld [vmem:[#allocation2 + $0x18] sm:$0xff]  ;;  %v342_v22 = vsel %vm253_vm0, %v339_v19, 0.0 }
  0x7a   : > { %v341_v21 = vld [vmem:[#allocation2 + $0x8] sm:$0xf]  ;;  %v343_v23 = vadd.f32 %v342_v22, %v338_v18 }
  0x7b   : > { %v345_v24 = vsel %vm253_vm0, %v341_v21, 0.0 }
  0x7c   : > { %v344_v25 = vadd.f32 %v343_v23, %v340_v20 }
  0x7e   : > { %v346_v26 = vadd.f32 %v345_v24, %v344_v25 }
  0x80   : > { %347 = vadd.xlane.f32.xlu0 %v346_v26 }
  0xf3   : > { %v348_v27 = vpop.xlane.xlu0 %347 }
  0xf4   : > { %v349_v28 = vrot.slane %v348_v27, 4 }
  0xf6   : > { %v350_v29 = vadd.f32 %v349_v28, %v348_v27 }
  0xf8   : > { %v351_v30 = vrot.slane %v350_v29, 2 }
  0xfa   : > { %v352_v31 = vadd.f32 %v351_v30, %v350_v29 }
  0xfc   : > { %v353_v32 = vrot.slane %v352_v31, 1 }
  0xfe   : > { %v354_v33 = vadd.f32 %v353_v32, %v352_v31 }
 0x100   : > { %487 = vpush %v354_v33 }
 0x131   : > { %s488_s12 = spop %487 }
 0x132   : > { %s356_s14 = smul.f32 1.9073486e-06, %s488_s12 }
 0x134   : > { %v357_v34 = vstv %s356_s14 }
 0x135   : > { %358 = vst [vmem:[%s229_s28] sm:$0xff] %v357_v34 }
 0x136 PF: > { %s484_s24 = sshll.u32 %s687_s15, 3  ;;  %s372_s19 = sshll.u32 %s229_s28, 4  ;;  %s373_s19 = int_to_ptr.vmem [resolvable:$true] %s372_s19 }
 0x137   : > { %s370_s8 = scalar_lea.hbm %s901_s2, %s484_s24  ;;  %s360_s20 = scalar_lea.sflag [#allocation5], %s227_s27 }
 0x138   : > { %s374_s23 = sshll.u32 %s370_s8, 4  ;;  %s609_s14 = scalar_lea.hbm %s901_s2, 16  ;;  %s375_s23 = int_to_ptr.hbm [resolvable:$true] %s374_s23 }
 0x139   : > { %s603_s26 = sshra.s32 %s375_s23, 4  ;;  %s604_s26 = int_to_ptr.hbm [resolvable:$true] %s603_s26 }
 0x13a   : > { %s605_s25 = scalar_lea.hbm %s604_s26, 8  ;;  %p610_p10 = scmp.lt.s32.totalorder %s604_s26, %s901_s2 }
 0x13b   : > { %p606_p6 = scmp.ne.s32.totalorder %s604_s26, %s605_s25  ;;  %p611_p11 = scmp.lt.s32.totalorder %s609_s14, %s605_s25 }
 0x13d   : > { %p607_p7 = pnand %p606_p6, %p798_p9  ;;  %p612_p13 = por %p611_p11, %p610_p10 }
 0x13f   : > { %p608_p8 = pneg %p607_p7 }
 0x141   : > { %p613_p0 = pnand %p612_p13, %p608_p8 }
 0x143   : > { %616 = shalt.err (!%p613_p0)
}
 0x144   : > { %489 = dma.vmem_to_hbm [thread:$0]  (%p798_p9), %s373_s19, 128, %s375_s23, %s360_s20  }
 0x145 PF: > { %p495_p1 = scmp.ge.s32.totalorder %s699_s18, 2  ;;  %s386_s27 = sand.u32 1, %s663_s9  }
 0x146   : > { %s387_s30 = scalar_lea.sflag [#allocation5], %s386_s27 }
 0x147   : > { %p492_p2 = pnand %p495_p1, %p808_p12 }
 0x149   : > { %p493_p3 = pneg %p492_p2 }
 0x14b   : > { %658 = dma.done.wait (%p493_p3), %s387_s30, 128  }
 0x14c   : > { %660 = vsyncadd (%p493_p3), %s387_s30, 4294967168  ;;  %s15_s18 = sadd.s32 1, %s699_s18   ;;  %s905_s9 = smov %s667_s10 }
 0x14d   : > { %p12_p4 = scmp.ge.s32.totalorder %s15_s18, 10   ;;  %s906_s10 = smov %s671_s11 }
 0x14e   : > { %s907_s11 = smov %s803_s5  ;;  %s908_s12 = smov %s679_s13 }
 0x14f   : > { %s909_s13 = smov %s806_s6  ;;  %s910_s14 = smov %s691_s16 }
 0x150   : > { %s911_s15 = smov %s695_s17  ;;  %s912_s16 = smov %s915_s21 }
 0x151   : > { %s913_s17 = smov %s919_s22  ;;  %14 = sbr.rel (!%p12_p4) target bundleno = 6 (0x6), region = 117 }
 0x156   :  { %393 = vsyncpa [#allocation5], 1 }
 0x157   :  { %395 = vsyncpa [#allocation5 + $0x1], 1 }

</bundles_post_ra>
